<compile_context>
chip_gen: v7x
topology: tpu7x:2x2x1
jax: 0.10.0
libtpu: 0.0.40
codegen_flags: <defaults>
</compile_context>

<pallas_src>
import functools

import jax
import jax.numpy as jnp
from jax import lax
from jax.experimental import pallas as pl
from jax.experimental.pallas import tpu as pltpu


def _round_up(n: int, m: int) -> int:
    return -(-n // m) * m


def _next_pow2(n: int) -> int:
    return 1 if n <= 1 else 1 << (n - 1).bit_length()


def _vmem_capacity_bytes() -> int:
    """Per-core VMEM capacity; conservative v7x fallback if the query fails."""
    try:
        cap = int(pltpu.get_tpu_info().vmem_capacity_bytes)
        if cap > 0:
            return cap
    except Exception:
        pass
    return 64 * 1024 * 1024


def _conv_bn_relu_kernel(xm_ref, xh_ref, w_ref, b_ref, o_ref, xw_ref,
                         *, K, dilation, TL, HALO):
    # xm_ref : (1, TL, Cp)     main input tile (compute dtype)
    # xh_ref : (1, HALO, Cp)   right-halo rows (head of the next tile, same array)
    # w_ref  : (K, Cp, Cp)     BN-folded conv taps (compute dtype, resident)
    # b_ref  : (1, Cp)         BN-folded bias (f32, resident)
    # o_ref  : (1, TL, Cp)     output tile
    # xw_ref : VMEM (TL+HALO, Cp) scratch — contiguous halo'd window
    #
    # Assemble the halo'd window (overlapping windows cannot be expressed with
    # Blocked BlockSpecs); the copy hides under the input/output DMA for
    # memory-bound shapes.
    xw_ref[0:TL, :] = xm_ref[0]
    xw_ref[TL:TL + HALO, :] = xh_ref[0]

    # Dilated conv = K shifted tall-skinny MXU matmuls, f32 value accumulator.
    # NOTE: off = k*dilation may be sublane-misaligned; Mosaic may retile the
    # shifted slice — acceptable vs. the cost of pre-shifted HBM layouts.
    acc = jnp.dot(xw_ref[0:TL, :], w_ref[0], preferred_element_type=jnp.float32)
    for k in range(1, K):
        off = k * dilation
        acc += jnp.dot(xw_ref[off:off + TL, :], w_ref[k],
                       preferred_element_type=jnp.float32)

    # Folded-BN bias + ReLU epilogue in f32, single store.
    y = acc + b_ref[...]
    o_ref[0] = jnp.maximum(y, 0.0).astype(o_ref.dtype)


def dilated_conv_block(x, weight, bias, gamma, beta, run_mean, run_var,
                       *, dilation=1, eps=1e-5, tile_l=1024, compute_dtype=None):
    """Inference forward of DilatedConvBlock.

    x: (B, L, C); weight: (Cout, Cin, K) in PyTorch Conv1d layout; returns (B, L, C).
    compute_dtype: dtype of the MXU operands (e.g. jnp.bfloat16); accumulation is
    always f32.  None keeps the input dtype.
    """
    B, L, C = x.shape
    Cout, Cin, K = weight.shape
    assert Cout == C and Cin == C
    halo = (K - 1) * dilation
    # torch returns L-1 samples when (K-1)*dilation is odd; not supported here.
    assert halo % 2 == 0, "(kernel_size-1)*dilation must be even for same-length output"
    pad = halo // 2
    dt = x.dtype
    cd = jnp.dtype(compute_dtype) if compute_dtype is not None else jnp.dtype(dt)

    Cp = _round_up(C, 128)                       # lane-dense channel count
    HALO = max(8, _next_pow2(max(halo, 1)))      # halo rows, sublane aligned, divides TL

    # ---- Generation-aware L-tile selection (VMEM budget) --------------------
    csize = cd.itemsize
    osize = jnp.dtype(dt).itemsize
    cap = _vmem_capacity_bytes()
    budget = int(0.7 * cap)
    # per-row bytes: 2x main tile (double-buffered) + 2x out tile + xw scratch + f32 acc
    per_row = Cp * (2 * csize + 2 * osize + csize + 4)
    # fixed bytes: weights (counted 2x to stay safe if Buffered(1) falls back),
    # halo double-buffer, bias, small margin.
    fixed = 2 * K * Cp * Cp * csize + 2 * HALO * Cp * csize + 2 * Cp * 4 + (1 << 20)
    budget_rows = max(HALO, (budget - fixed) // per_row)
    cand = max(8, min(int(tile_l), _round_up(L, 8), int(budget_rows)))
    align = HALO if cand < 256 else max(256, HALO)   # 256-granular M for v6e/v7x MXU
    TL = max(HALO, (cand // align) * align)          # multiple of HALO by construction
    nL = -(-L // TL)
    est_vmem = fixed + per_row * TL
    vmem_limit = int(min(0.9 * cap, max(2 * est_vmem, 32 * 1024 * 1024)))

    # ---- Fold BatchNorm (eval mode) into conv weights / bias (f32) ----------
    scale = gamma.astype(jnp.float32) * lax.rsqrt(run_var.astype(jnp.float32) + eps)
    w_taps = (jnp.transpose(weight, (2, 1, 0)).astype(jnp.float32)
              * scale[None, None, :])                                   # (K, Cin, Cout)
    b_fold = (bias.astype(jnp.float32) - run_mean.astype(jnp.float32)) * scale \
             + beta.astype(jnp.float32)

    # Zero-pad channels to Cp (padded lanes stay exactly 0 through ReLU).
    w_p = jnp.zeros((K, Cp, Cp), jnp.float32).at[:, :C, :C].set(w_taps).astype(cd)
    b_p = jnp.zeros((1, Cp), jnp.float32).at[0, :C].set(b_fold)

    # Pad x: 'same' conv padding on the left; right-pad so every tile plus its
    # halo is in range; channel-pad to Cp; cast to the compute dtype.
    Ltot = nL * TL + HALO
    x_pad = jnp.pad(x, ((0, 0), (pad, Ltot - pad - L), (0, Cp - C))).astype(cd)

    kernel = functools.partial(_conv_bn_relu_kernel,
                               K=K, dilation=dilation, TL=TL, HALO=HALO)

    cost = pl.CostEstimate(
        flops=2 * B * nL * TL * K * Cp * Cp,
        transcendentals=0,
        bytes_accessed=(B * nL * (TL + HALO) * Cp * csize
                        + K * Cp * Cp * csize + Cp * 4
                        + B * nL * TL * Cp * osize))

    def _run(single_buffer_consts):
        const_kw = {"pipeline_mode": pl.Buffered(1)} if single_buffer_consts else {}
        in_specs = [
            # main L-tile of the padded input
            pl.BlockSpec((1, TL, Cp), lambda b, j: (b, j, 0)),
            # halo rows: second view of the same padded input (no HBM duplicate)
            pl.BlockSpec((1, HALO, Cp),
                         lambda b, j: (b, (j + 1) * (TL // HALO), 0)),
            # constant operands -> stay resident; single-buffer when supported
            pl.BlockSpec((K, Cp, Cp), lambda b, j: (0, 0, 0), **const_kw),
            pl.BlockSpec((1, Cp), lambda b, j: (0, 0), **const_kw),
        ]
        return pl.pallas_call(
            kernel,
            grid=(B, nL),
            in_specs=in_specs,
            out_specs=pl.BlockSpec((1, TL, Cp), lambda b, j: (b, j, 0)),
            out_shape=jax.ShapeDtypeStruct((B, nL * TL, Cp), dt),
            scratch_shapes=[pltpu.VMEM((TL + HALO, Cp), cd)],
            compiler_params=pltpu.CompilerParams(
                dimension_semantics=("parallel", "parallel"),
                vmem_limit_bytes=vmem_limit),
            cost_estimate=cost,
        )(x_pad, x_pad, w_p, b_p)

    try:
        out_p = _run(True)
    except Exception:
        # pl.Buffered(1) not supported on this jax version -> default buffering.
        out_p = _run(False)

    # Fast path: skip the output slice (an extra HBM read+write) when aligned.
    if nL * TL == L and Cp == C:
        return out_p
    return out_p[:, :L, :C]


def _reference(x, weight, bias, gamma, beta, run_mean, run_var, *, dilation, eps):
    # Pure-JAX reference mirroring the PyTorch forward (eval mode).
    K = weight.shape[-1]
    pad = (K - 1) * dilation // 2
    xt = jnp.transpose(x, (0, 2, 1))                    # (B, C, L) — NCW, like torch
    conv = lax.conv_general_dilated(
        xt, weight, window_strides=(1,), padding=[(pad, pad)],
        rhs_dilation=(dilation,), dimension_numbers=('NCH', 'OIH', 'NCH'))
    conv = conv + bias[None, :, None]
    scale = gamma / jnp.sqrt(run_var + eps)
    bn = (conv - run_mean[None, :, None]) * scale[None, :, None] + beta[None, :, None]
    return jnp.transpose(jnp.maximum(bn, 0.0), (0, 2, 1))


if __name__ == "__main__":
    B, L, C = 2, 16, 8
    K, dilation, eps = 3, 2, 1e-5

    key = jax.random.PRNGKey(0)
    k_x, k_w, k_b, k_g, k_bt, k_m, k_v = jax.random.split(key, 7)

    x = jax.random.normal(k_x, (B, L, C), jnp.float32)
    weight = jax.random.normal(k_w, (C, C, K), jnp.float32) * 0.2   # (Cout, Cin, K)
    bias = jax.random.normal(k_b, (C,), jnp.float32) * 0.1
    gamma = 1.0 + 0.1 * jax.random.normal(k_g, (C,), jnp.float32)
    beta = 0.1 * jax.random.normal(k_bt, (C,), jnp.float32)
    run_mean = 0.1 * jax.random.normal(k_m, (C,), jnp.float32)
    run_var = 1.0 + 0.1 * jnp.abs(jax.random.normal(k_v, (C,), jnp.float32))

    ref = _reference(x, weight, bias, gamma, beta, run_mean, run_var,
                     dilation=dilation, eps=eps)

    # Exact-dtype path (MXU operands in the input dtype).
    out = dilated_conv_block(x, weight, bias, gamma, beta, run_mean, run_var,
                             dilation=dilation, eps=eps)
    out = jax.block_until_ready(out)
    assert out.shape == (B, L, C)
    assert jnp.allclose(out, ref, atol=2e-3, rtol=2e-3), "f32 path mismatch vs JAX reference"

    # bf16 MXU-operand path (f32 accumulation) — looser tolerance by construction.
    out_bf16 = dilated_conv_block(x, weight, bias, gamma, beta, run_mean, run_var,
                                  dilation=dilation, eps=eps,
                                  compute_dtype=jnp.bfloat16)
    out_bf16 = jax.block_until_ready(out_bf16)
    assert jnp.allclose(out_bf16, ref, atol=6e-2, rtol=6e-2), "bf16 path mismatch vs JAX reference"

    print("KERNEL_OK")
</pallas_src>

<mosaic_0001>
module attributes {stable_mosaic.version = 11 : i64} {
  func.func @_conv_bn_relu_kernel(%arg0: i32, %arg1: i32, %arg2: memref<1x16x128xf32, #tpu.memory_space<vmem>>, %arg3: memref<1x8x128xf32, #tpu.memory_space<vmem>>, %arg4: memref<3x128x128xf32, #tpu.memory_space<vmem>>, %arg5: memref<1x128xf32, #tpu.memory_space<vmem>>, %arg6: memref<1x16x128xf32, #tpu.memory_space<vmem>>, %arg7: memref<24x128xf32, #tpu.memory_space<vmem>>) attributes {dimension_semantics = [#tpu.dimension_semantics<parallel>, #tpu.dimension_semantics<parallel>], iteration_bounds = array<i64: 2, 1>, scalar_prefetch = 0 : i64, scratch_operands = 1 : i64, tpu.core_type = #tpu.core_type<tc>, window_params = [{transform_indices = @transform_0, window_bounds = array<i64: 1, 16, 128>}, {transform_indices = @transform_1, window_bounds = array<i64: 1, 8, 128>}, {pipeline_mode = #tpu.pipeline_mode<synchronous>, transform_indices = @transform_2, window_bounds = array<i64: 3, 128, 128>}, {pipeline_mode = #tpu.pipeline_mode<synchronous>, transform_indices = @transform_3, window_bounds = array<i64: 1, 128>}, {transform_indices = @transform_4, window_bounds = array<i64: 1, 16, 128>}]} {
    %c0 = arith.constant 0 : index
    %c0_0 = arith.constant 0 : index
    %c0_1 = arith.constant 0 : index
    %0 = vector.load %arg2[%c0, %c0_0, %c0_1] : memref<1x16x128xf32, #tpu.memory_space<vmem>>, vector<1x16x128xf32>
    %1 = vector.shape_cast %0 : vector<1x16x128xf32> to vector<16x128xf32>
    %c0_2 = arith.constant 0 : index
    %c0_3 = arith.constant 0 : index
    %2 = vector.load %arg7[%c0_2, %c0_3] : memref<24x128xf32, #tpu.memory_space<vmem>>, vector<16x128xf32>
    tpu.vector_store %arg7[%c0_2, %c0_3], %1 {strides = array<i32>} : memref<24x128xf32, #tpu.memory_space<vmem>>, vector<16x128xf32>,
    %c0_4 = arith.constant 0 : index
    %c0_5 = arith.constant 0 : index
    %c0_6 = arith.constant 0 : index
    %3 = vector.load %arg3[%c0_4, %c0_5, %c0_6] : memref<1x8x128xf32, #tpu.memory_space<vmem>>, vector<1x8x128xf32>
    %4 = vector.shape_cast %3 : vector<1x8x128xf32> to vector<8x128xf32>
    %c16 = arith.constant 16 : index
    %c0_7 = arith.constant 0 : index
    %5 = vector.load %arg7[%c16, %c0_7] : memref<24x128xf32, #tpu.memory_space<vmem>>, vector<8x128xf32>
    tpu.vector_store %arg7[%c16, %c0_7], %4 {strides = array<i32>} : memref<24x128xf32, #tpu.memory_space<vmem>>, vector<8x128xf32>,
    %c0_8 = arith.constant 0 : index
    %c0_9 = arith.constant 0 : index
    %6 = vector.load %arg7[%c0_8, %c0_9] : memref<24x128xf32, #tpu.memory_space<vmem>>, vector<16x128xf32>
    %c0_10 = arith.constant 0 : index
    %c0_11 = arith.constant 0 : index
    %c0_12 = arith.constant 0 : index
    %7 = vector.load %arg4[%c0_10, %c0_11, %c0_12] : memref<3x128x128xf32, #tpu.memory_space<vmem>>, vector<1x128x128xf32>
    %8 = vector.shape_cast %7 : vector<1x128x128xf32> to vector<128x128xf32>
    %cst = arith.constant dense<0.000000e+00> : vector<16x128xf32>
    %9 = tpu.matmul %6, %8, %cst {dimension_numbers = #tpu.dot_dimension_numbers<[1], [0], [0], [1], [0, 0, 1, 1], [], []>} : vector<16x128xf32>, vector<128x128xf32>, vector<16x128xf32> -> vector<16x128xf32>
    %c2 = arith.constant 2 : index
    %c0_13 = arith.constant 0 : index
    %10 = vector.load %arg7[%c2, %c0_13] : memref<24x128xf32, #tpu.memory_space<vmem>>, vector<16x128xf32>
    %c1 = arith.constant 1 : index
    %c0_14 = arith.constant 0 : index
    %c0_15 = arith.constant 0 : index
    %11 = vector.load %arg4[%c1, %c0_14, %c0_15] : memref<3x128x128xf32, #tpu.memory_space<vmem>>, vector<1x128x128xf32>
    %12 = vector.shape_cast %11 : vector<1x128x128xf32> to vector<128x128xf32>
    %cst_16 = arith.constant dense<0.000000e+00> : vector<16x128xf32>
    %13 = tpu.matmul %10, %12, %cst_16 {dimension_numbers = #tpu.dot_dimension_numbers<[1], [0], [0], [1], [0, 0, 1, 1], [], []>} : vector<16x128xf32>, vector<128x128xf32>, vector<16x128xf32> -> vector<16x128xf32>
    %14 = arith.addf %9, %13 : vector<16x128xf32>
    %c4 = arith.constant 4 : index
    %c0_17 = arith.constant 0 : index
    %15 = vector.load %arg7[%c4, %c0_17] : memref<24x128xf32, #tpu.memory_space<vmem>>, vector<16x128xf32>
    %c2_18 = arith.constant 2 : index
    %c0_19 = arith.constant 0 : index
    %c0_20 = arith.constant 0 : index
    %16 = vector.load %arg4[%c2_18, %c0_19, %c0_20] : memref<3x128x128xf32, #tpu.memory_space<vmem>>, vector<1x128x128xf32>
    %17 = vector.shape_cast %16 : vector<1x128x128xf32> to vector<128x128xf32>
    %cst_21 = arith.constant dense<0.000000e+00> : vector<16x128xf32>
    %18 = tpu.matmul %15, %17, %cst_21 {dimension_numbers = #tpu.dot_dimension_numbers<[1], [0], [0], [1], [0, 0, 1, 1], [], []>} : vector<16x128xf32>, vector<128x128xf32>, vector<16x128xf32> -> vector<16x128xf32>
    %19 = arith.addf %14, %18 : vector<16x128xf32>
    %c0_22 = arith.constant 0 : index
    %c0_23 = arith.constant 0 : index
    %20 = vector.load %arg5[%c0_22, %c0_23] : memref<1x128xf32, #tpu.memory_space<vmem>>, vector<1x128xf32>
    %21 = vector.broadcast %20 : vector<1x128xf32> to vector<16x128xf32>
    %22 = arith.addf %19, %21 : vector<16x128xf32>
    %cst_24 = arith.constant 0.000000e+00 : f32
    %23 = vector.broadcast %cst_24 : f32 to vector<16x128xf32>
    %24 = arith.maximumf %22, %23 : vector<16x128xf32>
    %c0_25 = arith.constant 0 : index
    %c0_26 = arith.constant 0 : index
    %c0_27 = arith.constant 0 : index
    %25 = vector.load %arg6[%c0_25, %c0_26, %c0_27] : memref<1x16x128xf32, #tpu.memory_space<vmem>>, vector<1x16x128xf32>
    %26 = vector.shape_cast %25 : vector<1x16x128xf32> to vector<16x128xf32>
    %27 = vector.shape_cast %24 : vector<16x128xf32> to vector<1x16x128xf32>
    tpu.vector_store %arg6[%c0_25, %c0_26, %c0_27], %27 {strides = array<i32>} : memref<1x16x128xf32, #tpu.memory_space<vmem>>, vector<1x16x128xf32>,
    return
  }
  func.func @transform_0(%arg0: i32, %arg1: i32) -> (i32, i32, i32) {
    %c0_i32 = arith.constant 0 : i32
    %c0_i32_0 = arith.constant 0 : i32
    return %arg0, %arg1, %c0_i32 : i32, i32, i32
  }
  func.func @transform_1(%arg0: i32, %arg1: i32) -> (i32, i32, i32) {
    %c1_i32 = arith.constant 1 : i32
    %0 = arith.addi %arg1, %c1_i32 : i32
    %c2_i32 = arith.constant 2 : i32
    %1 = arith.muli %0, %c2_i32 : i32
    %c0_i32 = arith.constant 0 : i32
    %c0_i32_0 = arith.constant 0 : i32
    return %arg0, %1, %c0_i32 : i32, i32, i32
  }
  func.func @transform_2(%arg0: i32, %arg1: i32) -> (i32, i32, i32) {
    %c0_i32 = arith.constant 0 : i32
    %c0_i32_0 = arith.constant 0 : i32
    %c0_i32_1 = arith.constant 0 : i32
    %c0_i32_2 = arith.constant 0 : i32
    return %c0_i32, %c0_i32_0, %c0_i32_1 : i32, i32, i32
  }
  func.func @transform_3(%arg0: i32, %arg1: i32) -> (i32, i32) {
    %c0_i32 = arith.constant 0 : i32
    %c0_i32_0 = arith.constant 0 : i32
    %c0_i32_1 = arith.constant 0 : i32
    return %c0_i32, %c0_i32_0 : i32, i32
  }
  func.func @transform_4(%arg0: i32, %arg1: i32) -> (i32, i32, i32) {
    %c0_i32 = arith.constant 0 : i32
    %c0_i32_0 = arith.constant 0 : i32
    return %arg0, %arg1, %c0_i32 : i32, i32, i32
  }
}

module attributes {stable_mosaic.version = 11 : i64} {
  func.func @_conv_bn_relu_kernel(%arg0: i32, %arg1: i32, %arg2: memref<1x16x128xf32, #tpu.memory_space<vmem>>, %arg3: memref<1x8x128xf32, #tpu.memory_space<vmem>>, %arg4: memref<3x128x128xf32, #tpu.memory_space<vmem>>, %arg5: memref<1x128xf32, #tpu.memory_space<vmem>>, %arg6: memref<1x16x128xf32, #tpu.memory_space<vmem>>, %arg7: memref<24x128xf32, #tpu.memory_space<vmem>>) attributes {dimension_semantics = [#tpu.dimension_semantics<parallel>, #tpu.dimension_semantics<parallel>], iteration_bounds = array<i64: 2, 1>, scalar_prefetch = 0 : i64, scratch_operands = 1 : i64, tpu.core_type = #tpu.core_type<tc>, window_params = [{transform_indices = @transform_0, window_bounds = array<i64: 1, 16, 128>}, {transform_indices = @transform_1, window_bounds = array<i64: 1, 8, 128>}, {pipeline_mode = #tpu.pipeline_mode<synchronous>, transform_indices = @transform_2, window_bounds = array<i64: 3, 128, 128>}, {pipeline_mode = #tpu.pipeline_mode<synchronous>, transform_indices = @transform_3, window_bounds = array<i64: 1, 128>}, {transform_indices = @transform_4, window_bounds = array<i64: 1, 16, 128>}]} {
    %c0 = arith.constant 0 : index
    %c0_0 = arith.constant 0 : index
    %c0_1 = arith.constant 0 : index
    %0 = vector.load %arg2[%c0, %c0_0, %c0_1] : memref<1x16x128xf32, #tpu.memory_space<vmem>>, vector<1x16x128xf32>
    %1 = vector.shape_cast %0 : vector<1x16x128xf32> to vector<16x128xf32>
    %c0_2 = arith.constant 0 : index
    %c0_3 = arith.constant 0 : index
    %2 = vector.load %arg7[%c0_2, %c0_3] : memref<24x128xf32, #tpu.memory_space<vmem>>, vector<16x128xf32>
    tpu.vector_store %arg7[%c0_2, %c0_3], %1 {strides = array<i32>} : memref<24x128xf32, #tpu.memory_space<vmem>>, vector<16x128xf32>,
    %c0_4 = arith.constant 0 : index
    %c0_5 = arith.constant 0 : index
    %c0_6 = arith.constant 0 : index
    %3 = vector.load %arg3[%c0_4, %c0_5, %c0_6] : memref<1x8x128xf32, #tpu.memory_space<vmem>>, vector<1x8x128xf32>
    %4 = vector.shape_cast %3 : vector<1x8x128xf32> to vector<8x128xf32>
    %c16 = arith.constant 16 : index
    %c0_7 = arith.constant 0 : index
    %5 = vector.load %arg7[%c16, %c0_7] : memref<24x128xf32, #tpu.memory_space<vmem>>, vector<8x128xf32>
    tpu.vector_store %arg7[%c16, %c0_7], %4 {strides = array<i32>} : memref<24x128xf32, #tpu.memory_space<vmem>>, vector<8x128xf32>,
    %c0_8 = arith.constant 0 : index
    %c0_9 = arith.constant 0 : index
    %6 = vector.load %arg7[%c0_8, %c0_9] : memref<24x128xf32, #tpu.memory_space<vmem>>, vector<16x128xf32>
    %c0_10 = arith.constant 0 : index
    %c0_11 = arith.constant 0 : index
    %c0_12 = arith.constant 0 : index
    %7 = vector.load %arg4[%c0_10, %c0_11, %c0_12] : memref<3x128x128xf32, #tpu.memory_space<vmem>>, vector<1x128x128xf32>
    %8 = vector.shape_cast %7 : vector<1x128x128xf32> to vector<128x128xf32>
    %cst = arith.constant dense<0.000000e+00> : vector<16x128xf32>
    %9 = tpu.matmul %6, %8, %cst {dimension_numbers = #tpu.dot_dimension_numbers<[1], [0], [0], [1], [0, 0, 1, 1], [], []>} : vector<16x128xf32>, vector<128x128xf32>, vector<16x128xf32> -> vector<16x128xf32>
    %c2 = arith.constant 2 : index
    %c0_13 = arith.constant 0 : index
    %10 = vector.load %arg7[%c2, %c0_13] : memref<24x128xf32, #tpu.memory_space<vmem>>, vector<16x128xf32>
    %c1 = arith.constant 1 : index
    %c0_14 = arith.constant 0 : index
    %c0_15 = arith.constant 0 : index
    %11 = vector.load %arg4[%c1, %c0_14, %c0_15] : memref<3x128x128xf32, #tpu.memory_space<vmem>>, vector<1x128x128xf32>
    %12 = vector.shape_cast %11 : vector<1x128x128xf32> to vector<128x128xf32>
    %cst_16 = arith.constant dense<0.000000e+00> : vector<16x128xf32>
    %13 = tpu.matmul %10, %12, %cst_16 {dimension_numbers = #tpu.dot_dimension_numbers<[1], [0], [0], [1], [0, 0, 1, 1], [], []>} : vector<16x128xf32>, vector<128x128xf32>, vector<16x128xf32> -> vector<16x128xf32>
    %14 = arith.addf %9, %13 : vector<16x128xf32>
    %c4 = arith.constant 4 : index
    %c0_17 = arith.constant 0 : index
    %15 = vector.load %arg7[%c4, %c0_17] : memref<24x128xf32, #tpu.memory_space<vmem>>, vector<16x128xf32>
    %c2_18 = arith.constant 2 : index
    %c0_19 = arith.constant 0 : index
    %c0_20 = arith.constant 0 : index
    %16 = vector.load %arg4[%c2_18, %c0_19, %c0_20] : memref<3x128x128xf32, #tpu.memory_space<vmem>>, vector<1x128x128xf32>
    %17 = vector.shape_cast %16 : vector<1x128x128xf32> to vector<128x128xf32>
    %cst_21 = arith.constant dense<0.000000e+00> : vector<16x128xf32>
    %18 = tpu.matmul %15, %17, %cst_21 {dimension_numbers = #tpu.dot_dimension_numbers<[1], [0], [0], [1], [0, 0, 1, 1], [], []>} : vector<16x128xf32>, vector<128x128xf32>, vector<16x128xf32> -> vector<16x128xf32>
    %19 = arith.addf %14, %18 : vector<16x128xf32>
    %c0_22 = arith.constant 0 : index
    %c0_23 = arith.constant 0 : index
    %20 = vector.load %arg5[%c0_22, %c0_23] : memref<1x128xf32, #tpu.memory_space<vmem>>, vector<1x128xf32>
    %21 = vector.broadcast %20 : vector<1x128xf32> to vector<16x128xf32>
    %22 = arith.addf %19, %21 : vector<16x128xf32>
    %cst_24 = arith.constant 0.000000e+00 : f32
    %23 = vector.broadcast %cst_24 : f32 to vector<16x128xf32>
    %24 = arith.maximumf %22, %23 : vector<16x128xf32>
    %c0_25 = arith.constant 0 : index
    %c0_26 = arith.constant 0 : index
    %c0_27 = arith.constant 0 : index
    %25 = vector.load %arg6[%c0_25, %c0_26, %c0_27] : memref<1x16x128xf32, #tpu.memory_space<vmem>>, vector<1x16x128xf32>
    %26 = vector.shape_cast %25 : vector<1x16x128xf32> to vector<16x128xf32>
    %27 = vector.shape_cast %24 : vector<16x128xf32> to vector<1x16x128xf32>
    tpu.vector_store %arg6[%c0_25, %c0_26, %c0_27], %27 {strides = array<i32>} : memref<1x16x128xf32, #tpu.memory_space<vmem>>, vector<1x16x128xf32>,
    return
  }
  func.func @transform_0(%arg0: i32, %arg1: i32) -> (i32, i32, i32) {
    %c0_i32 = arith.constant 0 : i32
    %c0_i32_0 = arith.constant 0 : i32
    return %arg0, %arg1, %c0_i32 : i32, i32, i32
  }
  func.func @transform_1(%arg0: i32, %arg1: i32) -> (i32, i32, i32) {
    %c1_i32 = arith.constant 1 : i32
    %0 = arith.addi %arg1, %c1_i32 : i32
    %c2_i32 = arith.constant 2 : i32
    %1 = arith.muli %0, %c2_i32 : i32
    %c0_i32 = arith.constant 0 : i32
    %c0_i32_0 = arith.constant 0 : i32
    return %arg0, %1, %c0_i32 : i32, i32, i32
  }
  func.func @transform_2(%arg0: i32, %arg1: i32) -> (i32, i32, i32) {
    %c0_i32 = arith.constant 0 : i32
    %c0_i32_0 = arith.constant 0 : i32
    %c0_i32_1 = arith.constant 0 : i32
    %c0_i32_2 = arith.constant 0 : i32
    return %c0_i32, %c0_i32_0, %c0_i32_1 : i32, i32, i32
  }
  func.func @transform_3(%arg0: i32, %arg1: i32) -> (i32, i32) {
    %c0_i32 = arith.constant 0 : i32
    %c0_i32_0 = arith.constant 0 : i32
    %c0_i32_1 = arith.constant 0 : i32
    return %c0_i32, %c0_i32_0 : i32, i32
  }
  func.func @transform_4(%arg0: i32, %arg1: i32) -> (i32, i32, i32) {
    %c0_i32 = arith.constant 0 : i32
    %c0_i32_0 = arith.constant 0 : i32
    return %arg0, %arg1, %c0_i32 : i32, i32, i32
  }
}

</mosaic_0001>

<bundles_post_ra>
// kernel: tpu_custom_call.1
= control target key start
LH: loop header
LB: loop body
LE: loop exit
PB: predicated region body
PF: predicated region fallthrough
CT: control target
= control target key end

     0   :  { %s1600_s0 = inlined_call_operand.hbm [shape: f32[2,24,128], index: 0, kind: input, shape index: {}]   ;;  %s1601_s1 = inlined_call_operand.hbm [shape: f32[2,24,128], index: 1, kind: input, shape index: {}]   ;;  %s1602_s2 = inlined_call_operand.hbm [shape: f32[3,128,128], index: 2, kind: input, shape index: {}]   ;;  %s1603_s3 = inlined_call_operand.vmem [shape: f32[1,128], index: 3, kind: input, shape index: {}]   ;;  %s1604_s4 = inlined_call_operand.hbm [shape: f32[2,16,128], index: 4, kind: output, shape index: {}]  }
   0x1   :  { %1613 = sst [smem:[#allocation17_spill]] %s1600_s0 }
   0x2   :  { %1614 = sst [smem:[#allocation18_spill]] %s1602_s2 }
   0x3   :  { %9 = vsyncpa [#allocation4], 0 }
   0x4   :  { %11 = vsyncpa [#allocation4 + $0x1], 0 }
   0x5   :  { %12 = vsyncpa [#allocation7], 0 }
   0x6   :  { %14 = vsyncpa [#allocation7 + $0x1], 0 }
   0x7   :  { %15 = vsyncpa [#allocation5], 0 }
   0x8   :  { %17 = vsyncpa [#allocation5 + $0x1], 0  ;;  %s1327_s15 = smov 0   ;;  %s1329_s16 = smov 0  }
   0x9   :  { %s1331_s17 = smov 0   ;;  %s1333_s18 = smov 0  }
   0xa   :  { %s1335_s19 = smov 0   ;;  %s1337_s20 = smov 0  }
   0xb LB: > { %1615 = sst [smem:[#allocation14_spill]] %s1280_s17  ;;  %s1358_s21 = sadd.s32 4294967295, %s1292_s20   ;;  %s1292_s20 = sphi %s1337_s20, %s23_s20   ;;  %s1288_s19 = sphi %s1335_s19, %s1643_s19   ;;  %s1284_s18 = sphi %s1333_s18, %s1642_s18   ;;  %s1280_s17 = sphi %s1331_s17, %s1638_s17   ;;  %s1276_s16 = sphi %s1329_s16, %s1641_s16   ;;  %s1272_s15 = sphi %s1327_s15, %s1640_s15  }
   0xc   : > { %s751_s22 = sadd.s32 4294967294, %s1292_s20   ;;  %p57_p0 = scmp.ne.s32.totalorder %s1276_s16, %s1272_s15 }
   0xd   : > { %p1605_p1 = scmp.eq.s32.totalorder %s1358_s21, 0  ;;  %p163_p3 = scmp.eq.s32.totalorder %s751_s22, 1 }
   0xe   : > { %p752_p5 = scmp.ge.s32.totalorder %s1292_s20, 1  ;;  %p170_p7 = scmp.lt.s32.totalorder %s1292_s20, 3 }
   0xf   : > { %p1367_p4 = por %p1605_p1, %p57_p0  ;;  %p1372_p6 = por %p163_p3, %p57_p0 }
  0x10   : > { %p1377_p8 = pnand %p752_p5, %p170_p7  ;;  %s1294_s26 = smov [#allocation8]  }
  0x11   : > { %s1616_s23 = scalar_select %p1367_p4, 1, 0 }
  0x12   : > { %s1617_s24 = scalar_select %p1372_p6, 1, 0 }
  0x13   : > { %s1618_s25 = scalar_select %p1377_p8, 1, 0 }
  0x14   : > { %s182_s27 = sshll.u32 %s1294_s26, 4  ;;  %p1041_p9 = pneg %p1377_p8  ;;  %s183_s27 = int_to_ptr.vmem [resolvable:$true] %s182_s27 }
  0x15   : > { %s35_s29 = sadd.s32 1, %s1288_s19  ;;  %s1620_s2 = sld [smem:[#allocation18_spill]] }
  0x16   : > { %p1386_p11 = pnand %p1041_p9, %p1605_p1 }
  0x18   : > { %p1115_p13 = pneg %p1386_p11 }
  0x1b   : > { %s1113_s6 = scalar_lea.hbm %s1620_s2, 6144 }
  0x1c   : > { %p1114_p12 = scmp.ne.s32.totalorder %s1620_s2, %s1113_s6  ;;  %p1120_p5 = scmp.lt.u32.totalorder %s1113_s6, %s1620_s2 }
  0x1e   : > { %p1116_p0 = pnand %p1115_p13, %p1114_p12 }
  0x20   : > { %p1117_p3 = pneg %p1116_p0 }
  0x22   : > { %p1122_p7 = pnand %p1120_p5, %p1117_p3 }
  0x24   : > { %1125 = shalt.err (!%p1122_p7)
}
  0x25   : > { %s1126_s11 = scalar_lea.vmem %s183_s27, 6144  ;;  %p1134_p2 = scmp.lt.s32.totalorder %s183_s27, %s183_s27 }
  0x26   : > { %p1127_p9 = scmp.ne.s32.totalorder %s183_s27, %s1126_s11  ;;  %p1135_p6 = scmp.lt.s32.totalorder %s1126_s11, %s1126_s11 }
  0x28   : > { %p1129_p10 = pnand %p1127_p9, %p1115_p13  ;;  %p1136_p4 = por %p1135_p6, %p1134_p2 }
  0x2a   : > { %p1130_p1 = pneg %p1129_p10 }
  0x2c   : > { %p1137_p8 = pnand %p1136_p4, %p1130_p1 }
  0x2e   : > { %1140 = shalt.err (!%p1137_p8)
}
  0x2f   : > { %s1609_s12 = smov 128   ;;  %s1296_s13 = smov 8  }
  0x30   : > { %1044 = dma.hbm_to_vmem [thread:$0]  (!%p1386_p11), %s1620_s2, 6144, %s183_s27, [#allocation7], %s1609_s12, %s1609_s12, %s1296_s13  }
  0x31   : > { %p37_p1 = scmp.ge.s32.totalorder %s35_s29, 2  ;;  %s44_s26 = sadd.s32 1, %s1280_s17 }
  0x32   : > { %p51_p2 = scmp.ne.s32.totalorder %s1280_s17, %s1276_s16  ;;  %p52_p4 = scmp.eq.s32.totalorder %s1292_s20, 0 }
  0x33   : > { %s1645_s29 = smov (%p37_p1, %s35_s29), 0  ;;  %p1622_p8 = scmp.eq.s32.totalorder %s1358_s21, 1 }
  0x34   : > { %1621 = sst [smem:[#allocation15_spill]] %s1645_s29  ;;  %p53_p6 = por %p52_p4, %p51_p2 }
  0x35   : > { %p1418_p10 = por %p1622_p8, %p51_p2  ;;  %s39_s30 = ssub.s32 %s1288_s19, %s1645_s29 }
  0x36   : > { %p1057_p12 = scmp.lt.s32.totalorder %s1292_s20, 2  ;;  %p42_p13 = scmp.eq.s32.totalorder %s39_s30, 0 }
  0x37   : > { %s1623_s28 = scalar_select %p1418_p10, 1, 0 }
  0x38   : > { %s1426_s5 = sand.u32 1, %s1280_s17   ;;  %s1608_s7 = smul.u32 384, %s1288_s19 }
  0x39   : > { %s755_s27 = sshll.u32 %s1426_s5, 4  ;;  %p1433_p11 = pnand %p1057_p12, %p53_p6 }
  0x3a   : > { %s1430_s6 = scalar_select %p42_p13, %s1280_s17, %s44_s26  }
  0x3b   : > { %s203_s8 = scalar_lea.vmem [#allocation3], %s755_s27  ;;  %s1626_s0 = sld [smem:[#allocation17_spill]] }
  0x3c   : > { %1624 = sst [smem:[#allocation16_spill]] %s1430_s6  ;;  %s218_s9 = sshll.u32 %s203_s8, 4  ;;  %s1444_s9 = int_to_ptr.vmem [resolvable:$true] %s218_s9 }
  0x3d   : > { %s200_s30 = scalar_lea.sflag [#allocation4], %s1426_s5  ;;  %p1143_p3 = pneg %p1433_p11 }
  0x41   : > { %s1442_s22 = scalar_lea.hbm %s1626_s0, %s1608_s7  ;;  %s1146_s14 = scalar_lea.hbm %s1626_s0, 768 }
  0x42   : > { %s1141_s27 = scalar_lea.hbm %s1442_s22, 256  ;;  %p1147_p9 = scmp.lt.u32.totalorder %s1442_s22, %s1626_s0 }
  0x43   : > { %p1142_p0 = scmp.ne.s32.totalorder %s1442_s22, %s1141_s27  ;;  %p1148_p1 = scmp.lt.u32.totalorder %s1146_s14, %s1141_s27 }
  0x44   : > { %p1150_p4 = scmp.lt.u32.totalorder %s1141_s27, %s1442_s22 }
  0x45   : > { %p1144_p5 = pnand %p1143_p3, %p1142_p0  ;;  %p1149_p2 = por %p1148_p1, %p1147_p9 }
  0x47   : > { %p1145_p7 = pneg %p1144_p5  ;;  %p1151_p6 = por %p1150_p4, %p1149_p2 }
  0x49   : > { %p1152_p8 = pnand %p1151_p6, %p1145_p7 }
  0x4b   : > { %1155 = shalt.err (!%p1152_p8)
}
  0x4c   : > { %s1156_s26 = scalar_lea.vmem %s1444_s9, 256  ;;  %s1297_s8 = smov [#allocation3]  }
  0x4d   : > { %p1157_p12 = scmp.ne.s32.totalorder %s1444_s9, %s1156_s26  ;;  %s1161_s11 = sshll.u32 %s1297_s8, 4  ;;  %s1162_s11 = int_to_ptr.vmem [resolvable:$false] %s1161_s11 }
  0x4e   : > { %s1163_s12 = scalar_lea.vmem %s1162_s11, 512  ;;  %p1164_p5 = scmp.lt.s32.totalorder %s1444_s9, %s1162_s11 }
  0x4f   : > { %p1159_p13 = pnand %p1157_p12, %p1143_p3  ;;  %p1165_p9 = scmp.lt.s32.totalorder %s1163_s12, %s1156_s26 }
  0x51   : > { %p1160_p0 = pneg %p1159_p13  ;;  %p1166_p1 = por %p1165_p9, %p1164_p5 }
  0x53   : > { %p1167_p2 = pnand %p1166_p1, %p1160_p0 }
  0x55   : > { %1170 = shalt.err (!%p1167_p2)
}
  0x56   : > { %s1627_s7 = smov 128   ;;  %s757_s27 = sshll.u32 %s1426_s5, 3 }
  0x57   : > { %1048 = dma.hbm_to_vmem [thread:$0]  (!%p1433_p11), %s1442_s22, 256, %s1444_s9, %s200_s30, %s1627_s7, %s1627_s7, %s1296_s13  }
  0x58   : > { %s1628_s14 = smul.u32 384, %s1288_s19  ;;  %s232_s0 = scalar_lea.vmem [#allocation6], %s757_s27 }
  0x59   : > { %s243_s2 = sshll.u32 %s232_s0, 4  ;;  %s1629_s29 = sand.u32 1, %s1292_s20   ;;  %s244_s2 = int_to_ptr.vmem [resolvable:$true] %s243_s2 }
  0x5a   : > { %s672_s11 = scalar_lea.hbm %s1601_s1, %s1628_s14  ;;  %s229_s6 = scalar_lea.sflag [#allocation7], %s1629_s29 }
  0x5b   : > { %s1484_s12 = scalar_lea.hbm %s672_s11, 256  ;;  %s1201_s17 = scalar_lea.hbm %s672_s11, 384 }
  0x5c   : > { %p1172_p7 = scmp.ne.s32.totalorder %s1484_s12, %s1201_s17  ;;  %s1176_s9 = scalar_lea.hbm %s1601_s1, 768 }
  0x5d   : > { %p1177_p8 = scmp.lt.u32.totalorder %s1484_s12, %s1601_s1  ;;  %p1178_p12 = scmp.lt.u32.totalorder %s1176_s9, %s1201_s17 }
  0x5e   : > { %p1174_p4 = pnand %p1172_p7, %p1143_p3  ;;  %p1180_p0 = scmp.lt.u32.totalorder %s1201_s17, %s1484_s12 }
  0x5f   : > { %p1179_p13 = por %p1178_p12, %p1177_p8 }
  0x60   : > { %p1175_p6 = pneg %p1174_p4 }
  0x61   : > { %p1181_p5 = por %p1180_p0, %p1179_p13 }
  0x63   : > { %p1182_p9 = pnand %p1181_p5, %p1175_p6 }
  0x65   : > { %1185 = shalt.err (!%p1182_p9)
}
  0x66   : > { %s1186_s0 = scalar_lea.vmem %s244_s2, 128  ;;  %s1298_s29 = smov [#allocation6]  }
  0x67   : > { %p1187_p1 = scmp.ne.s32.totalorder %s244_s2, %s1186_s0  ;;  %s1191_s7 = sshll.u32 %s1298_s29, 4  ;;  %s1192_s7 = int_to_ptr.vmem [resolvable:$false] %s1191_s7 }
  0x68   : > { %s1193_s27 = scalar_lea.vmem %s1192_s7, 256  ;;  %p1194_p4 = scmp.lt.s32.totalorder %s244_s2, %s1192_s7 }
  0x69   : > { %p1189_p2 = pnand %p1187_p1, %p1143_p3  ;;  %p1195_p10 = scmp.lt.s32.totalorder %s1193_s27, %s1186_s0 }
  0x6b   : > { %p1190_p7 = pneg %p1189_p2  ;;  %p1196_p8 = por %p1195_p10, %p1194_p4 }
  0x6d   : > { %p1197_p12 = pnand %p1196_p8, %p1190_p7 }
  0x6f   : > { %1200 = shalt.err (!%p1197_p12)
}
  0x70   : > { %1051 = dma.hbm_to_vmem [thread:$0]  (!%p1433_p11), %s1484_s12, 128, %s244_s2, %s229_s6  }
  0x71   : > { %p1630_p6 = scmp.ne.s32.totalorder %s1618_s25, 0 }
  0x72   : > { %s1509_s17 = sand.u32 (!%p1630_p6), 1, %s1276_s16   ;;  %p1631_p10 = scmp.ne.s32.totalorder (!%p1630_p6), %s1616_s23, 0 }
  0x73   : > { %252 = sbr.rel (%p1630_p6) target bundleno = 430 (0x1ae), region = 36  ;;  %s760_s14 = sshll.u32 (!%p1630_p6), %s1509_s17, 4 }
  0x74   : > { %s255_s26 = scalar_lea.sflag (!%p1630_p6), [#allocation4], %s1509_s17  ;;  %s1515_s8 = scalar_lea.vmem (!%p1630_p6), [#allocation3], %s760_s14 }
  0x7a   : > { %1255 = dma.done.wait (%p1631_p10), %s255_s26, 256  }
  0x7b   : > { %1257 = vsyncadd (%p1631_p10), %s255_s26, 4294967040  ;;  %s263_s2 = sand.u32 1, %s1358_s21   ;;  %s761_s25 = sshll.u32 %s1509_s17, 3 }
  0x7c   : > { %s264_s6 = scalar_lea.sflag [#allocation7], %s263_s2  ;;  %s1523_s10 = scalar_lea.vmem [#allocation6], %s761_s25 }
  0x7d   : > { %1259 = dma.done.wait (%p1631_p10), %s264_s6, 128  }
  0x7e   : > { %1261 = vsyncadd (%p1631_p10), %s264_s6, 4294967168  ;;  %p1632_p11 = scmp.eq.s32.totalorder %s1358_s21, 0 }
  0x80   : > { %1263 = dma.done.wait (%p1632_p11), [#allocation7], 6144   ;;  %p1633_p3 = pmov %p1632_p11 }
  0x81   : > { %v317_v0 = vld [vmem:[#allocation8] sm:$0xff]  ;;  %v318_v1 = vld [vmem:[#allocation8 + $0x8] sm:$0xff]  ;;  %v319_v2 = vld [vmem:[#allocation8 + $0x10] sm:$0xff]  ;;  %s300_s11 = scalar_lea.vmem [#allocation9], %s760_s14  ;;  %s770_s13 = sshll.u32 %s1284_s18, 8 }
  0x82   : > { %1265 = vsyncadd (%p1633_p3), [#allocation7], 4294961152  ;;  %v962_v3 = vpack.c.bf16 %v318_v1, %v317_v0  ;;  %v320_v4 = vld [vmem:[#allocation8 + $0x18] sm:$0xff]  ;;  %v321_v6 = vld [vmem:[#allocation8 + $0x20] sm:$0xff]  ;;  %s627_s12 = sshll.u32 %s300_s11, 4  ;;  %s1551_s22 = scalar_lea.hbm %s1604_s4, %s770_s13  ;;  %s1546_s12 = int_to_ptr.vmem [resolvable:$true] %s627_s12 }
  0x83   : > { %v966_v5 = vpack.c.bf16 %v320_v4, %v319_v2  ;;  %v322_v7 = vld [vmem:[#allocation8 + $0x28] sm:$0xff]  ;;  %v336_v9 = vld [vmem:[#allocation8 + $0x80] sm:$0xff]  ;;  %v323_v11 = vld [vmem:[#allocation8 + $0x30] sm:$0xff]  ;;  %s612_s30 = scalar_lea.sflag [#allocation5], %s1509_s17  ;;  %s1202_s0 = scalar_lea.vmem %s1546_s12, 256 }
  0x84   : > { %963 = vmatprep.subr.bf16.mxu0 %v962_v3  ;;  %v970_v8 = vpack.c.bf16 %v322_v7, %v321_v6  ;;  %v337_v10 = vld [vmem:[#allocation8 + $0x88] sm:$0xff]  ;;  %v324_v12 = vld [vmem:[#allocation8 + $0x38] sm:$0xff]  ;;  %v309_v14 = vld [vmem:[%s1515_s8] sm:$0xff]  ;;  %p1203_p13 = scmp.ne.s32.totalorder %s1546_s12, %s1202_s0  ;;  %p1634_p0 = scmp.ne.s32.totalorder %s1623_s28, 0 }
  0x85   : > { %965 = vmatpush3.bf16.msra.mxu0 %v962_v3  ;;  %v930_v13 = vpack.c.bf16 %v337_v10, %v336_v9  ;;  %311 = vst [vmem:[#allocation2] sm:$0xff] %v309_v14  ;;  %892 = vmatprep.mubr.f32.mxu0 %v309_v14  ;;  %v1535_v15 = vld [vmem:[%s1515_s8 + $0x8] sm:$0xff]  ;;  %v338_v16 = vld [vmem:[#allocation8 + $0x90] sm:$0xff]  ;;  %v340_v19 = vld [vmem:[#allocation8 + $0xa0] sm:$0xff]  ;;  %v974_v20 = vpack.c.bf16 %v324_v12, %v323_v11  ;;  %s1299_s18 = smov [#allocation9]  }
  0x86   : > { %967 = vmatprep.subr.bf16.mxu0 %v966_v5  ;;  %v339_v17 = vld [vmem:[#allocation8 + $0x98] sm:$0xff]  ;;  %312 = vst [vmem:[#allocation2 + $0x8] sm:$0xff] %v1535_v15  ;;  %v341_v21 = vld [vmem:[#allocation8 + $0xa8] sm:$0xff]  ;;  %v325_v22 = vld [vmem:[#allocation8 + $0x40] sm:$0xff]  ;;  %p1204_p5 = pnand %p1203_p13, %p1634_p0  ;;  %s1206_s29 = sshll.u32 %s1299_s18, 4  ;;  %s1207_s29 = int_to_ptr.vmem [resolvable:$false] %s1206_s29 }
  0x87   : > { %931 = vmatprep.subr.bf16.mxu1 %v930_v13  ;;  %v934_v18 = vpack.c.bf16 %v339_v17, %v338_v16  ;;  %v326_v23 = vld [vmem:[#allocation8 + $0x48] sm:$0xff]  ;;  %v938_v24 = vpack.c.bf16 %v341_v21, %v340_v19  ;;  %v342_v25 = vld [vmem:[#allocation8 + $0xb0] sm:$0xff]  ;;  %v343_v26 = vld [vmem:[#allocation8 + $0xb8] sm:$0xff]  ;;  %s1208_s7 = scalar_lea.vmem %s1207_s29, 512  ;;  %p1209_p1 = scmp.lt.s32.totalorder %s1546_s12, %s1207_s29 }
  0x88   : > { %933 = vmatpush3.bf16.msra.mxu1 %v930_v13  ;;  %v978_v27 = vpack.c.bf16 %v326_v23, %v325_v22  ;;  %v327_v28 = vld [vmem:[#allocation8 + $0x50] sm:$0xff]  ;;  %v328_v29 = vld [vmem:[#allocation8 + $0x58] sm:$0xff]  ;;  %v942_v30 = vpack.c.bf16 %v343_v26, %v342_v25  ;;  %v344_v31 = vld [vmem:[#allocation8 + $0xc0] sm:$0xff]  ;;  %p1205_p9 = pneg %p1204_p5  ;;  %p1210_p2 = scmp.lt.s32.totalorder %s1208_s7, %s1202_s0 }
  0x89   : > { %969 = vmatpush3.bf16.msra.mxu0 %v966_v5  ;;  %935 = vmatprep.subr.bf16.mxu1 %v934_v18  ;;  %v345_v32 = vld [vmem:[#allocation8 + $0xc8] sm:$0xff]  ;;  %v982_v34 = vpack.c.bf16 %v328_v29, %v327_v28  ;;  %v313_v35 = vld [vmem:[%s1523_s10] sm:$0xff]  ;;  %v329_v36 = vld [vmem:[#allocation8 + $0x60] sm:$0xff] }
  0x8a   : > { %971 = vmatprep.subr.bf16.mxu0 %v970_v8  ;;  %v330_v37 = vld [vmem:[#allocation8 + $0x68] sm:$0xff]  ;;  %v946_v38 = vpack.c.bf16 %v345_v32, %v344_v31  ;;  %314 = vst [vmem:[#allocation2 + $0x10] sm:$0xff] %v313_v35  ;;  %v346_v39 = vld [vmem:[#allocation8 + $0xd0] sm:$0xff]  ;;  %v347_v40 = vld [vmem:[#allocation8 + $0xd8] sm:$0xff]  ;;  %p1211_p7 = por %p1210_p2, %p1209_p1 }
  0x8b   : > { %v986_v41 = vpack.c.bf16 %v330_v37, %v329_v36  ;;  %v331_v42 = vld [vmem:[#allocation8 + $0x70] sm:$0xff]  ;;  %v332_v43 = vld [vmem:[#allocation8 + $0x78] sm:$0xff]  ;;  %v950_v44 = vpack.c.bf16 %v347_v40, %v346_v39  ;;  %v348_v45 = vld [vmem:[#allocation8 + $0xe0] sm:$0xff] }
  0x8c   : > { %937 = vmatpush3.bf16.msra.mxu1 %v934_v18  ;;  %v349_v46 = vld [vmem:[#allocation8 + $0xe8] sm:$0xff]  ;;  %v990_v47 = vpack.c.bf16 %v332_v43, %v331_v42  ;;  %v505_v48 = vld [vmem:[#allocation8 + $0x100] sm:$0xff]  ;;  %v350_v51 = vld [vmem:[#allocation8 + $0xf0] sm:$0xff]  ;;  %p1212_p4 = pnand %p1211_p7, %p1205_p9 }
  0x8d   : > { %973 = vmatpush3.bf16.msra.mxu0 %v970_v8  ;;  %939 = vmatprep.subr.bf16.mxu1 %v938_v24  ;;  %v333_v33 = vld [vmem:[#allocation2 + $0x2] sm:$0xff]  ;;  %v506_v49 = vld [vmem:[#allocation8 + $0x108] sm:$0xff]  ;;  %v954_v50 = vpack.c.bf16 %v349_v46, %v348_v45  ;;  %v507_v54 = vld [vmem:[#allocation8 + $0x110] sm:$0xff] }
  0x8e   : > { %975 = vmatprep.subr.bf16.mxu0 %v974_v20  ;;  %857 = vmatprep.mubr.f32.mxu1 %v333_v33  ;;  %v351_v52 = vld [vmem:[#allocation8 + $0xf8] sm:$0xff]  ;;  %v994_v53 = vpack.c.bf16 %v506_v49, %v505_v48  ;;  %v509_v59 = vld [vmem:[#allocation8 + $0x120] sm:$0xff]  ;;  %v510_v60 = vld [vmem:[#allocation8 + $0x128] sm:$0xff] }
  0x8f   : > { %v508_v55 = vld [vmem:[#allocation8 + $0x118] sm:$0xff]  ;;  %v958_v56 = vpack.c.bf16 %v351_v52, %v350_v51  ;;  %v1002_v61 = vpack.c.bf16 %v510_v60, %v509_v59  ;;  %v511_v63 = vld [vmem:[#allocation8 + $0x130] sm:$0xff]  ;;  %v513_v2 = vld [vmem:[#allocation8 + $0x140] sm:$0xff] }
  0x90   : > { %941 = vmatpush3.bf16.msra.mxu1 %v938_v24  ;;  %v998_v57 = vpack.c.bf16 %v508_v55, %v507_v54  ;;  %v502_v58 = vld [vmem:[#allocation2 + $0x4] sm:$0xff]  ;;  %v514_v3 = vld [vmem:[#allocation8 + $0x148] sm:$0xff]  ;;  %v515_v5 = vld [vmem:[#allocation8 + $0x150] sm:$0xff] }
  0x91   : > { %977 = vmatpush3.bf16.msra.mxu0 %v974_v20  ;;  %943 = vmatprep.subr.bf16.mxu1 %v942_v30  ;;  %v334_v62 = vld [vmem:[#allocation2 + $0xa] sm:$0xff]  ;;  %v512_v0 = vld [vmem:[#allocation8 + $0x138] sm:$0xff]  ;;  %v1010_v4 = vpack.c.bf16 %v514_v3, %v513_v2  ;;  %v519_v11 = vld [vmem:[#allocation8 + $0x170] sm:$0xff] }
  0x92   : > { %979 = vmatprep.subr.bf16.mxu0 %v978_v27  ;;  %v1006_v1 = vpack.c.bf16 %v512_v0, %v511_v63  ;;  %v516_v6 = vld [vmem:[#allocation8 + $0x158] sm:$0xff]  ;;  %v517_v8 = vld [vmem:[#allocation8 + $0x160] sm:$0xff]  ;;  %v518_v9 = vld [vmem:[#allocation8 + $0x168] sm:$0xff] }
  0x93   : > { %v1014_v7 = vpack.c.bf16 %v516_v6, %v515_v5  ;;  %v1018_v10 = vpack.c.bf16 %v518_v9, %v517_v8  ;;  %v520_v12 = vld [vmem:[#allocation8 + $0x178] sm:$0xff]  ;;  %v503_v14 = vld [vmem:[#allocation2 + $0xc] sm:$0xff] }
  0x94   : > { %945 = vmatpush3.bf16.msra.mxu1 %v942_v30  ;;  %v1022_v13 = vpack.c.bf16 %v520_v12, %v519_v11  ;;  %v764_v18 = vld [vmem:[%s1603_s3] ss:$0 sm:$0xff] }
  0x95   : > { %981 = vmatpush3.bf16.msra.mxu0 %v978_v27  ;;  %947 = vmatprep.subr.bf16.mxu1 %v946_v38 }
  0x96   : > { %983 = vmatprep.subr.bf16.mxu0 %v982_v34 }
  0x98   : > { %949 = vmatpush3.bf16.msra.mxu1 %v946_v38 }
  0x99   : > { %985 = vmatpush3.bf16.msra.mxu0 %v982_v34  ;;  %951 = vmatprep.subr.bf16.mxu1 %v950_v44 }
  0x9a   : > { %987 = vmatprep.subr.bf16.mxu0 %v986_v41 }
  0x9c   : > { %953 = vmatpush3.bf16.msra.mxu1 %v950_v44 }
  0x9d   : > { %989 = vmatpush3.bf16.msra.mxu0 %v986_v41  ;;  %955 = vmatprep.subr.bf16.mxu1 %v954_v50 }
  0x9e   : > { %991 = vmatprep.subr.bf16.mxu0 %v990_v47 }
  0xa0   : > { %957 = vmatpush3.bf16.msra.mxu1 %v954_v50 }
  0xa1   : > { %993 = vmatpush3.bf16.msra.mxu0 %v990_v47  ;;  %959 = vmatprep.subr.bf16.mxu1 %v958_v56 }
  0xa2   : > { %995 = vmatprep.subr.bf16.mxu0 %v994_v53 }
  0xa4   : > { %893 = vmatmul.mubr.f32.vlgmr.msra.gmra.mrb[0].mxu0 %v1535_v15  ;;  %961 = vmatpush3.bf16.msra.mxu1 %v958_v56 }
  0xa5   : > { %997 = vmatpush3.bf16.msra.mxu0 %v994_v53  ;;  %927 = vmatprep.mubr.f32.mxu0 %v502_v58 }
  0xa6   : > { %999 = vmatprep.subr.bf16.mxu0 %v998_v57 }
  0xa7   : > { %858 = vmatmul.mubr.f32.vlgmr.msra.gmra.mrb[0].mxu1 %v334_v62 }
  0xa9   : > { %1001 = vmatpush3.bf16.msra.mxu0 %v998_v57 }
  0xaa   : > { %1003 = vmatprep.subr.bf16.mxu0 %v1002_v61 }
  0xad   : > { %1005 = vmatpush3.bf16.msra.mxu0 %v1002_v61 }
  0xae   : > { %1007 = vmatprep.subr.bf16.mxu0 %v1006_v1 }
  0xb1   : > { %1009 = vmatpush3.bf16.msra.mxu0 %v1006_v1 }
  0xb2   : > { %1011 = vmatprep.subr.bf16.mxu0 %v1010_v4 }
  0xb5   : > { %1013 = vmatpush3.bf16.msra.mxu0 %v1010_v4 }
  0xb6   : > { %1015 = vmatprep.subr.bf16.mxu0 %v1014_v7 }
  0xb9   : > { %1017 = vmatpush3.bf16.msra.mxu0 %v1014_v7 }
  0xba   : > { %1019 = vmatprep.subr.bf16.mxu0 %v1018_v10 }
  0xbd   : > { %1021 = vmatpush3.bf16.msra.mxu0 %v1018_v10 }
  0xbe   : > { %1023 = vmatprep.subr.bf16.mxu0 %v1022_v13 }
  0xc1   : > { %1025 = vmatpush3.bf16.msra.mxu0 %v1022_v13 }
  0xc4   : > { %928 = vmatmul.mubr.f32.vlgmr.msra.gmra.mrb[0].mxu0 %v503_v14 }
 0x17a   : > { %v859_v15 = vpop.f32.mrb[0].mxu1 }
 0x17b   : > { %v418_v16 = vpop.f32.mrb[1].mxu1 }
 0x197   : > { %v929_v17 = vpop.f32.mrb[0].mxu0 }
 0x198   : > { %v1026_v19 = vadd.f32 %v929_v17, %v859_v15  ;;  %v587_v20 = vpop.f32.mrb[1].mxu0 }
 0x199   : > { %v1027_v21 = vadd.f32 %v587_v20, %v418_v16 }
 0x19a   : > { %v606_v22 = vadd.f32 %v1026_v19, %v764_v18 }
 0x19b   : > { %v605_v23 = vadd.f32 %v1027_v21, %v764_v18 }
 0x19c   : > { %v608_v24 = vmax.f32 %v606_v22, 0.0 }
 0x19d   : > { %v607_v25 = vmax.f32 %v605_v23, 0.0 }
 0x19e   : > { %610 = vst [vmem:[%s300_s11 + $0x8] sm:$0xff] %v608_v24 }
 0x19f   : > { %609 = vst [vmem:[%s300_s11] sm:$0xff] %v607_v25 }
 0x1a0   : > { %1215 = shalt.err (!%p1212_p4)
}
 0x1a1   : > { %s1216_s27 = scalar_lea.hbm %s1551_s22, 256  ;;  %s1220_s8 = scalar_lea.hbm %s1604_s4, 512 }
 0x1a2   : > { %p1217_p8 = scmp.ne.s32.totalorder %s1551_s22, %s1216_s27  ;;  %p1221_p10 = scmp.lt.u32.totalorder %s1551_s22, %s1604_s4 }
 0x1a3   : > { %p1222_p11 = scmp.lt.u32.totalorder %s1220_s8, %s1216_s27  ;;  %p1224_p13 = scmp.lt.u32.totalorder %s1216_s27, %s1551_s22 }
 0x1a4   : > { %p1218_p12 = pnand %p1217_p8, %p1634_p0 }
 0x1a5   : > { %p1223_p3 = por %p1222_p11, %p1221_p10 }
 0x1a6   : > { %p1219_p6 = pneg %p1218_p12 }
 0x1a7   : > { %p1225_p5 = por %p1224_p13, %p1223_p3 }
 0x1a9   : > { %p1226_p9 = pnand %p1225_p5, %p1219_p6 }
 0x1ab   : > { %1229 = shalt.err (!%p1226_p9)
}
 0x1ac   : > { %s1300_s6 = smov 128   ;;  %s1301_s10 = smov 8  }
 0x1ad   : > { %1039 = dma.vmem_to_hbm [thread:$0]  (%p1634_p0), %s1546_s12, 256, %s1551_s22, %s612_s30, %s1300_s6, %s1300_s6, %s1301_s10  }
 0x1ae PF: > { %s642_s21 = sand.u32 1, %s1272_s15   ;;  %p1635_p1 = scmp.ne.s32.totalorder %s1617_s24, 0 }
 0x1af   : > { %p1636_p2 = scmp.ge.s32.totalorder %s1292_s20, 2  ;;  %s643_s23 = scalar_lea.sflag [#allocation5], %s642_s21 }
 0x1b1   : > { %p1053_p7 = pnand %p1636_p2, %p1635_p1 }
 0x1b3   : > { %1267 = dma.done.wait (!%p1053_p7), %s643_s23, 256  }
 0x1b4   : > { %1269 = vsyncadd (!%p1053_p7), %s643_s23, 4294967040  ;;  %s23_s20 = sadd.s32 1, %s1292_s20   ;;  %s1637_s11 = sld [smem:[#allocation14_spill]] }
 0x1b5   : > { %p20_p4 = scmp.ge.s32.totalorder %s23_s20, 4   ;;  %s1638_s17 = sld [smem:[#allocation16_spill]] }
 0x1b6   : > { %s1639_s28 = sld [smem:[#allocation15_spill]]  ;;  %s1640_s15 = smov %s1276_s16 }
 0x1b7   : > { %s1642_s18 = smov %s1288_s19  ;;  %22 = sbr.rel (!%p20_p4) target bundleno = 11 (0xb), region = 100 }
 0x1ba   : > { %s1641_s16 = smov %s1637_s11 }
 0x1bc   : > { %s1643_s19 = smov %s1639_s28 }
 0x1be   :  { %648 = vsyncpa [#allocation4], 1 }
 0x1bf   :  { %650 = vsyncpa [#allocation4 + $0x1], 1 }
 0x1c0   :  { %651 = vsyncpa [#allocation7], 1 }
 0x1c1   :  { %653 = vsyncpa [#allocation7 + $0x1], 1 }
 0x1c2   :  { %654 = vsyncpa [#allocation5], 1 }
 0x1c3   :  { %656 = vsyncpa [#allocation5 + $0x1], 1 }

// kernel: tpu_custom_call.1
= control target key start
LH: loop header
LB: loop body
LE: loop exit
PB: predicated region body
PF: predicated region fallthrough
CT: control target
= control target key end

     0   :  { %s1600_s0 = inlined_call_operand.hbm [shape: f32[2,24,128], index: 0, kind: input, shape index: {}]   ;;  %s1601_s1 = inlined_call_operand.hbm [shape: f32[2,24,128], index: 1, kind: input, shape index: {}]   ;;  %s1602_s2 = inlined_call_operand.hbm [shape: f32[3,128,128], index: 2, kind: input, shape index: {}]   ;;  %s1603_s3 = inlined_call_operand.vmem [shape: f32[1,128], index: 3, kind: input, shape index: {}]   ;;  %s1604_s4 = inlined_call_operand.hbm [shape: f32[2,16,128], index: 4, kind: output, shape index: {}]  }
   0x1   :  { %1613 = sst [smem:[#allocation17_spill]] %s1600_s0 }
   0x2   :  { %1614 = sst [smem:[#allocation18_spill]] %s1602_s2 }
   0x3   :  { %9 = vsyncpa [#allocation4], 0 }
   0x4   :  { %11 = vsyncpa [#allocation4 + $0x1], 0 }
   0x5   :  { %12 = vsyncpa [#allocation7], 0 }
   0x6   :  { %14 = vsyncpa [#allocation7 + $0x1], 0 }
   0x7   :  { %15 = vsyncpa [#allocation5], 0 }
   0x8   :  { %17 = vsyncpa [#allocation5 + $0x1], 0  ;;  %s1327_s15 = smov 0   ;;  %s1329_s16 = smov 0  }
   0x9   :  { %s1331_s17 = smov 0   ;;  %s1333_s18 = smov 0  }
   0xa   :  { %s1335_s19 = smov 0   ;;  %s1337_s20 = smov 0  }
   0xb LB: > { %1615 = sst [smem:[#allocation14_spill]] %s1280_s17  ;;  %s1358_s21 = sadd.s32 4294967295, %s1292_s20   ;;  %s1292_s20 = sphi %s1337_s20, %s23_s20   ;;  %s1288_s19 = sphi %s1335_s19, %s1643_s19   ;;  %s1284_s18 = sphi %s1333_s18, %s1642_s18   ;;  %s1280_s17 = sphi %s1331_s17, %s1638_s17   ;;  %s1276_s16 = sphi %s1329_s16, %s1641_s16   ;;  %s1272_s15 = sphi %s1327_s15, %s1640_s15  }
   0xc   : > { %s751_s22 = sadd.s32 4294967294, %s1292_s20   ;;  %p57_p0 = scmp.ne.s32.totalorder %s1276_s16, %s1272_s15 }
   0xd   : > { %p1605_p1 = scmp.eq.s32.totalorder %s1358_s21, 0  ;;  %p163_p3 = scmp.eq.s32.totalorder %s751_s22, 1 }
   0xe   : > { %p752_p5 = scmp.ge.s32.totalorder %s1292_s20, 1  ;;  %p170_p7 = scmp.lt.s32.totalorder %s1292_s20, 3 }
   0xf   : > { %p1367_p4 = por %p1605_p1, %p57_p0  ;;  %p1372_p6 = por %p163_p3, %p57_p0 }
  0x10   : > { %p1377_p8 = pnand %p752_p5, %p170_p7  ;;  %s1294_s26 = smov [#allocation8]  }
  0x11   : > { %s1616_s23 = scalar_select %p1367_p4, 1, 0 }
  0x12   : > { %s1617_s24 = scalar_select %p1372_p6, 1, 0 }
  0x13   : > { %s1618_s25 = scalar_select %p1377_p8, 1, 0 }
  0x14   : > { %s182_s27 = sshll.u32 %s1294_s26, 4  ;;  %p1041_p9 = pneg %p1377_p8  ;;  %s183_s27 = int_to_ptr.vmem [resolvable:$true] %s182_s27 }
  0x15   : > { %s35_s29 = sadd.s32 1, %s1288_s19  ;;  %s1620_s2 = sld [smem:[#allocation18_spill]] }
  0x16   : > { %p1386_p11 = pnand %p1041_p9, %p1605_p1 }
  0x18   : > { %p1115_p13 = pneg %p1386_p11 }
  0x1b   : > { %s1113_s6 = scalar_lea.hbm %s1620_s2, 6144 }
  0x1c   : > { %p1114_p12 = scmp.ne.s32.totalorder %s1620_s2, %s1113_s6  ;;  %p1120_p5 = scmp.lt.u32.totalorder %s1113_s6, %s1620_s2 }
  0x1e   : > { %p1116_p0 = pnand %p1115_p13, %p1114_p12 }
  0x20   : > { %p1117_p3 = pneg %p1116_p0 }
  0x22   : > { %p1122_p7 = pnand %p1120_p5, %p1117_p3 }
  0x24   : > { %1125 = shalt.err (!%p1122_p7)
}
  0x25   : > { %s1126_s11 = scalar_lea.vmem %s183_s27, 6144  ;;  %p1134_p2 = scmp.lt.s32.totalorder %s183_s27, %s183_s27 }
  0x26   : > { %p1127_p9 = scmp.ne.s32.totalorder %s183_s27, %s1126_s11  ;;  %p1135_p6 = scmp.lt.s32.totalorder %s1126_s11, %s1126_s11 }
  0x28   : > { %p1129_p10 = pnand %p1127_p9, %p1115_p13  ;;  %p1136_p4 = por %p1135_p6, %p1134_p2 }
  0x2a   : > { %p1130_p1 = pneg %p1129_p10 }
  0x2c   : > { %p1137_p8 = pnand %p1136_p4, %p1130_p1 }
  0x2e   : > { %1140 = shalt.err (!%p1137_p8)
}
  0x2f   : > { %s1609_s12 = smov 128   ;;  %s1296_s13 = smov 8  }
  0x30   : > { %1044 = dma.hbm_to_vmem [thread:$0]  (!%p1386_p11), %s1620_s2, 6144, %s183_s27, [#allocation7], %s1609_s12, %s1609_s12, %s1296_s13  }
  0x31   : > { %p37_p1 = scmp.ge.s32.totalorder %s35_s29, 2  ;;  %s44_s26 = sadd.s32 1, %s1280_s17 }
  0x32   : > { %p51_p2 = scmp.ne.s32.totalorder %s1280_s17, %s1276_s16  ;;  %p52_p4 = scmp.eq.s32.totalorder %s1292_s20, 0 }
  0x33   : > { %s1645_s29 = smov (%p37_p1, %s35_s29), 0  ;;  %p1622_p8 = scmp.eq.s32.totalorder %s1358_s21, 1 }
  0x34   : > { %1621 = sst [smem:[#allocation15_spill]] %s1645_s29  ;;  %p53_p6 = por %p52_p4, %p51_p2 }
  0x35   : > { %p1418_p10 = por %p1622_p8, %p51_p2  ;;  %s39_s30 = ssub.s32 %s1288_s19, %s1645_s29 }
  0x36   : > { %p1057_p12 = scmp.lt.s32.totalorder %s1292_s20, 2  ;;  %p42_p13 = scmp.eq.s32.totalorder %s39_s30, 0 }
  0x37   : > { %s1623_s28 = scalar_select %p1418_p10, 1, 0 }
  0x38   : > { %s1426_s5 = sand.u32 1, %s1280_s17   ;;  %s1608_s7 = smul.u32 384, %s1288_s19 }
  0x39   : > { %s755_s27 = sshll.u32 %s1426_s5, 4  ;;  %p1433_p11 = pnand %p1057_p12, %p53_p6 }
  0x3a   : > { %s1430_s6 = scalar_select %p42_p13, %s1280_s17, %s44_s26  }
  0x3b   : > { %s203_s8 = scalar_lea.vmem [#allocation3], %s755_s27  ;;  %s1626_s0 = sld [smem:[#allocation17_spill]] }
  0x3c   : > { %1624 = sst [smem:[#allocation16_spill]] %s1430_s6  ;;  %s218_s9 = sshll.u32 %s203_s8, 4  ;;  %s1444_s9 = int_to_ptr.vmem [resolvable:$true] %s218_s9 }
  0x3d   : > { %s200_s30 = scalar_lea.sflag [#allocation4], %s1426_s5  ;;  %p1143_p3 = pneg %p1433_p11 }
  0x41   : > { %s1442_s22 = scalar_lea.hbm %s1626_s0, %s1608_s7  ;;  %s1146_s14 = scalar_lea.hbm %s1626_s0, 768 }
  0x42   : > { %s1141_s27 = scalar_lea.hbm %s1442_s22, 256  ;;  %p1147_p9 = scmp.lt.u32.totalorder %s1442_s22, %s1626_s0 }
  0x43   : > { %p1142_p0 = scmp.ne.s32.totalorder %s1442_s22, %s1141_s27  ;;  %p1148_p1 = scmp.lt.u32.totalorder %s1146_s14, %s1141_s27 }
  0x44   : > { %p1150_p4 = scmp.lt.u32.totalorder %s1141_s27, %s1442_s22 }
  0x45   : > { %p1144_p5 = pnand %p1143_p3, %p1142_p0  ;;  %p1149_p2 = por %p1148_p1, %p1147_p9 }
  0x47   : > { %p1145_p7 = pneg %p1144_p5  ;;  %p1151_p6 = por %p1150_p4, %p1149_p2 }
  0x49   : > { %p1152_p8 = pnand %p1151_p6, %p1145_p7 }
  0x4b   : > { %1155 = shalt.err (!%p1152_p8)
}
  0x4c   : > { %s1156_s26 = scalar_lea.vmem %s1444_s9, 256  ;;  %s1297_s8 = smov [#allocation3]  }
  0x4d   : > { %p1157_p12 = scmp.ne.s32.totalorder %s1444_s9, %s1156_s26  ;;  %s1161_s11 = sshll.u32 %s1297_s8, 4  ;;  %s1162_s11 = int_to_ptr.vmem [resolvable:$false] %s1161_s11 }
  0x4e   : > { %s1163_s12 = scalar_lea.vmem %s1162_s11, 512  ;;  %p1164_p5 = scmp.lt.s32.totalorder %s1444_s9, %s1162_s11 }
  0x4f   : > { %p1159_p13 = pnand %p1157_p12, %p1143_p3  ;;  %p1165_p9 = scmp.lt.s32.totalorder %s1163_s12, %s1156_s26 }
  0x51   : > { %p1160_p0 = pneg %p1159_p13  ;;  %p1166_p1 = por %p1165_p9, %p1164_p5 }
  0x53   : > { %p1167_p2 = pnand %p1166_p1, %p1160_p0 }
  0x55   : > { %1170 = shalt.err (!%p1167_p2)
}
  0x56   : > { %s1627_s7 = smov 128   ;;  %s757_s27 = sshll.u32 %s1426_s5, 3 }
  0x57   : > { %1048 = dma.hbm_to_vmem [thread:$0]  (!%p1433_p11), %s1442_s22, 256, %s1444_s9, %s200_s30, %s1627_s7, %s1627_s7, %s1296_s13  }
  0x58   : > { %s1628_s14 = smul.u32 384, %s1288_s19  ;;  %s232_s0 = scalar_lea.vmem [#allocation6], %s757_s27 }
  0x59   : > { %s243_s2 = sshll.u32 %s232_s0, 4  ;;  %s1629_s29 = sand.u32 1, %s1292_s20   ;;  %s244_s2 = int_to_ptr.vmem [resolvable:$true] %s243_s2 }
  0x5a   : > { %s672_s11 = scalar_lea.hbm %s1601_s1, %s1628_s14  ;;  %s229_s6 = scalar_lea.sflag [#allocation7], %s1629_s29 }
  0x5b   : > { %s1484_s12 = scalar_lea.hbm %s672_s11, 256  ;;  %s1201_s17 = scalar_lea.hbm %s672_s11, 384 }
  0x5c   : > { %p1172_p7 = scmp.ne.s32.totalorder %s1484_s12, %s1201_s17  ;;  %s1176_s9 = scalar_lea.hbm %s1601_s1, 768 }
  0x5d   : > { %p1177_p8 = scmp.lt.u32.totalorder %s1484_s12, %s1601_s1  ;;  %p1178_p12 = scmp.lt.u32.totalorder %s1176_s9, %s1201_s17 }
  0x5e   : > { %p1174_p4 = pnand %p1172_p7, %p1143_p3  ;;  %p1180_p0 = scmp.lt.u32.totalorder %s1201_s17, %s1484_s12 }
  0x5f   : > { %p1179_p13 = por %p1178_p12, %p1177_p8 }
  0x60   : > { %p1175_p6 = pneg %p1174_p4 }
  0x61   : > { %p1181_p5 = por %p1180_p0, %p1179_p13 }
  0x63   : > { %p1182_p9 = pnand %p1181_p5, %p1175_p6 }
  0x65   : > { %1185 = shalt.err (!%p1182_p9)
}
  0x66   : > { %s1186_s0 = scalar_lea.vmem %s244_s2, 128  ;;  %s1298_s29 = smov [#allocation6]  }
  0x67   : > { %p1187_p1 = scmp.ne.s32.totalorder %s244_s2, %s1186_s0  ;;  %s1191_s7 = sshll.u32 %s1298_s29, 4  ;;  %s1192_s7 = int_to_ptr.vmem [resolvable:$false] %s1191_s7 }
  0x68   : > { %s1193_s27 = scalar_lea.vmem %s1192_s7, 256  ;;  %p1194_p4 = scmp.lt.s32.totalorder %s244_s2, %s1192_s7 }
  0x69   : > { %p1189_p2 = pnand %p1187_p1, %p1143_p3  ;;  %p1195_p10 = scmp.lt.s32.totalorder %s1193_s27, %s1186_s0 }
  0x6b   : > { %p1190_p7 = pneg %p1189_p2  ;;  %p1196_p8 = por %p1195_p10, %p1194_p4 }
  0x6d   : > { %p1197_p12 = pnand %p1196_p8, %p1190_p7 }
  0x6f   : > { %1200 = shalt.err (!%p1197_p12)
}
  0x70   : > { %1051 = dma.hbm_to_vmem [thread:$0]  (!%p1433_p11), %s1484_s12, 128, %s244_s2, %s229_s6  }
  0x71   : > { %p1630_p6 = scmp.ne.s32.totalorder %s1618_s25, 0 }
  0x72   : > { %s1509_s17 = sand.u32 (!%p1630_p6), 1, %s1276_s16   ;;  %p1631_p10 = scmp.ne.s32.totalorder (!%p1630_p6), %s1616_s23, 0 }
  0x73   : > { %252 = sbr.rel (%p1630_p6) target bundleno = 430 (0x1ae), region = 36  ;;  %s760_s14 = sshll.u32 (!%p1630_p6), %s1509_s17, 4 }
  0x74   : > { %s255_s26 = scalar_lea.sflag (!%p1630_p6), [#allocation4], %s1509_s17  ;;  %s1515_s8 = scalar_lea.vmem (!%p1630_p6), [#allocation3], %s760_s14 }
  0x7a   : > { %1255 = dma.done.wait (%p1631_p10), %s255_s26, 256  }
  0x7b   : > { %1257 = vsyncadd (%p1631_p10), %s255_s26, 4294967040  ;;  %s263_s2 = sand.u32 1, %s1358_s21   ;;  %s761_s25 = sshll.u32 %s1509_s17, 3 }
  0x7c   : > { %s264_s6 = scalar_lea.sflag [#allocation7], %s263_s2  ;;  %s1523_s10 = scalar_lea.vmem [#allocation6], %s761_s25 }
  0x7d   : > { %1259 = dma.done.wait (%p1631_p10), %s264_s6, 128  }
  0x7e   : > { %1261 = vsyncadd (%p1631_p10), %s264_s6, 4294967168  ;;  %p1632_p11 = scmp.eq.s32.totalorder %s1358_s21, 0 }
  0x80   : > { %1263 = dma.done.wait (%p1632_p11), [#allocation7], 6144   ;;  %p1633_p3 = pmov %p1632_p11 }
  0x81   : > { %v317_v0 = vld [vmem:[#allocation8] sm:$0xff]  ;;  %v318_v1 = vld [vmem:[#allocation8 + $0x8] sm:$0xff]  ;;  %v319_v2 = vld [vmem:[#allocation8 + $0x10] sm:$0xff]  ;;  %s300_s11 = scalar_lea.vmem [#allocation9], %s760_s14  ;;  %s770_s13 = sshll.u32 %s1284_s18, 8 }
  0x82   : > { %1265 = vsyncadd (%p1633_p3), [#allocation7], 4294961152  ;;  %v962_v3 = vpack.c.bf16 %v318_v1, %v317_v0  ;;  %v320_v4 = vld [vmem:[#allocation8 + $0x18] sm:$0xff]  ;;  %v321_v6 = vld [vmem:[#allocation8 + $0x20] sm:$0xff]  ;;  %s627_s12 = sshll.u32 %s300_s11, 4  ;;  %s1551_s22 = scalar_lea.hbm %s1604_s4, %s770_s13  ;;  %s1546_s12 = int_to_ptr.vmem [resolvable:$true] %s627_s12 }
  0x83   : > { %v966_v5 = vpack.c.bf16 %v320_v4, %v319_v2  ;;  %v322_v7 = vld [vmem:[#allocation8 + $0x28] sm:$0xff]  ;;  %v336_v9 = vld [vmem:[#allocation8 + $0x80] sm:$0xff]  ;;  %v323_v11 = vld [vmem:[#allocation8 + $0x30] sm:$0xff]  ;;  %s612_s30 = scalar_lea.sflag [#allocation5], %s1509_s17  ;;  %s1202_s0 = scalar_lea.vmem %s1546_s12, 256 }
  0x84   : > { %963 = vmatprep.subr.bf16.mxu0 %v962_v3  ;;  %v970_v8 = vpack.c.bf16 %v322_v7, %v321_v6  ;;  %v337_v10 = vld [vmem:[#allocation8 + $0x88] sm:$0xff]  ;;  %v324_v12 = vld [vmem:[#allocation8 + $0x38] sm:$0xff]  ;;  %v309_v14 = vld [vmem:[%s1515_s8] sm:$0xff]  ;;  %p1203_p13 = scmp.ne.s32.totalorder %s1546_s12, %s1202_s0  ;;  %p1634_p0 = scmp.ne.s32.totalorder %s1623_s28, 0 }
  0x85   : > { %965 = vmatpush3.bf16.msra.mxu0 %v962_v3  ;;  %v930_v13 = vpack.c.bf16 %v337_v10, %v336_v9  ;;  %311 = vst [vmem:[#allocation2] sm:$0xff] %v309_v14  ;;  %892 = vmatprep.mubr.f32.mxu0 %v309_v14  ;;  %v1535_v15 = vld [vmem:[%s1515_s8 + $0x8] sm:$0xff]  ;;  %v338_v16 = vld [vmem:[#allocation8 + $0x90] sm:$0xff]  ;;  %v340_v19 = vld [vmem:[#allocation8 + $0xa0] sm:$0xff]  ;;  %v974_v20 = vpack.c.bf16 %v324_v12, %v323_v11  ;;  %s1299_s18 = smov [#allocation9]  }
  0x86   : > { %967 = vmatprep.subr.bf16.mxu0 %v966_v5  ;;  %v339_v17 = vld [vmem:[#allocation8 + $0x98] sm:$0xff]  ;;  %312 = vst [vmem:[#allocation2 + $0x8] sm:$0xff] %v1535_v15  ;;  %v341_v21 = vld [vmem:[#allocation8 + $0xa8] sm:$0xff]  ;;  %v325_v22 = vld [vmem:[#allocation8 + $0x40] sm:$0xff]  ;;  %p1204_p5 = pnand %p1203_p13, %p1634_p0  ;;  %s1206_s29 = sshll.u32 %s1299_s18, 4  ;;  %s1207_s29 = int_to_ptr.vmem [resolvable:$false] %s1206_s29 }
  0x87   : > { %931 = vmatprep.subr.bf16.mxu1 %v930_v13  ;;  %v934_v18 = vpack.c.bf16 %v339_v17, %v338_v16  ;;  %v326_v23 = vld [vmem:[#allocation8 + $0x48] sm:$0xff]  ;;  %v938_v24 = vpack.c.bf16 %v341_v21, %v340_v19  ;;  %v342_v25 = vld [vmem:[#allocation8 + $0xb0] sm:$0xff]  ;;  %v343_v26 = vld [vmem:[#allocation8 + $0xb8] sm:$0xff]  ;;  %s1208_s7 = scalar_lea.vmem %s1207_s29, 512  ;;  %p1209_p1 = scmp.lt.s32.totalorder %s1546_s12, %s1207_s29 }
  0x88   : > { %933 = vmatpush3.bf16.msra.mxu1 %v930_v13  ;;  %v978_v27 = vpack.c.bf16 %v326_v23, %v325_v22  ;;  %v327_v28 = vld [vmem:[#allocation8 + $0x50] sm:$0xff]  ;;  %v328_v29 = vld [vmem:[#allocation8 + $0x58] sm:$0xff]  ;;  %v942_v30 = vpack.c.bf16 %v343_v26, %v342_v25  ;;  %v344_v31 = vld [vmem:[#allocation8 + $0xc0] sm:$0xff]  ;;  %p1205_p9 = pneg %p1204_p5  ;;  %p1210_p2 = scmp.lt.s32.totalorder %s1208_s7, %s1202_s0 }
  0x89   : > { %969 = vmatpush3.bf16.msra.mxu0 %v966_v5  ;;  %935 = vmatprep.subr.bf16.mxu1 %v934_v18  ;;  %v345_v32 = vld [vmem:[#allocation8 + $0xc8] sm:$0xff]  ;;  %v982_v34 = vpack.c.bf16 %v328_v29, %v327_v28  ;;  %v313_v35 = vld [vmem:[%s1523_s10] sm:$0xff]  ;;  %v329_v36 = vld [vmem:[#allocation8 + $0x60] sm:$0xff] }
  0x8a   : > { %971 = vmatprep.subr.bf16.mxu0 %v970_v8  ;;  %v330_v37 = vld [vmem:[#allocation8 + $0x68] sm:$0xff]  ;;  %v946_v38 = vpack.c.bf16 %v345_v32, %v344_v31  ;;  %314 = vst [vmem:[#allocation2 + $0x10] sm:$0xff] %v313_v35  ;;  %v346_v39 = vld [vmem:[#allocation8 + $0xd0] sm:$0xff]  ;;  %v347_v40 = vld [vmem:[#allocation8 + $0xd8] sm:$0xff]  ;;  %p1211_p7 = por %p1210_p2, %p1209_p1 }
  0x8b   : > { %v986_v41 = vpack.c.bf16 %v330_v37, %v329_v36  ;;  %v331_v42 = vld [vmem:[#allocation8 + $0x70] sm:$0xff]  ;;  %v332_v43 = vld [vmem:[#allocation8 + $0x78] sm:$0xff]  ;;  %v950_v44 = vpack.c.bf16 %v347_v40, %v346_v39  ;;  %v348_v45 = vld [vmem:[#allocation8 + $0xe0] sm:$0xff] }
  0x8c   : > { %937 = vmatpush3.bf16.msra.mxu1 %v934_v18  ;;  %v349_v46 = vld [vmem:[#allocation8 + $0xe8] sm:$0xff]  ;;  %v990_v47 = vpack.c.bf16 %v332_v43, %v331_v42  ;;  %v505_v48 = vld [vmem:[#allocation8 + $0x100] sm:$0xff]  ;;  %v350_v51 = vld [vmem:[#allocation8 + $0xf0] sm:$0xff]  ;;  %p1212_p4 = pnand %p1211_p7, %p1205_p9 }
  0x8d   : > { %973 = vmatpush3.bf16.msra.mxu0 %v970_v8  ;;  %939 = vmatprep.subr.bf16.mxu1 %v938_v24  ;;  %v333_v33 = vld [vmem:[#allocation2 + $0x2] sm:$0xff]  ;;  %v506_v49 = vld [vmem:[#allocation8 + $0x108] sm:$0xff]  ;;  %v954_v50 = vpack.c.bf16 %v349_v46, %v348_v45  ;;  %v507_v54 = vld [vmem:[#allocation8 + $0x110] sm:$0xff] }
  0x8e   : > { %975 = vmatprep.subr.bf16.mxu0 %v974_v20  ;;  %857 = vmatprep.mubr.f32.mxu1 %v333_v33  ;;  %v351_v52 = vld [vmem:[#allocation8 + $0xf8] sm:$0xff]  ;;  %v994_v53 = vpack.c.bf16 %v506_v49, %v505_v48  ;;  %v509_v59 = vld [vmem:[#allocation8 + $0x120] sm:$0xff]  ;;  %v510_v60 = vld [vmem:[#allocation8 + $0x128] sm:$0xff] }
  0x8f   : > { %v508_v55 = vld [vmem:[#allocation8 + $0x118] sm:$0xff]  ;;  %v958_v56 = vpack.c.bf16 %v351_v52, %v350_v51  ;;  %v1002_v61 = vpack.c.bf16 %v510_v60, %v509_v59  ;;  %v511_v63 = vld [vmem:[#allocation8 + $0x130] sm:$0xff]  ;;  %v513_v2 = vld [vmem:[#allocation8 + $0x140] sm:$0xff] }
  0x90   : > { %941 = vmatpush3.bf16.msra.mxu1 %v938_v24  ;;  %v998_v57 = vpack.c.bf16 %v508_v55, %v507_v54  ;;  %v502_v58 = vld [vmem:[#allocation2 + $0x4] sm:$0xff]  ;;  %v514_v3 = vld [vmem:[#allocation8 + $0x148] sm:$0xff]  ;;  %v515_v5 = vld [vmem:[#allocation8 + $0x150] sm:$0xff] }
  0x91   : > { %977 = vmatpush3.bf16.msra.mxu0 %v974_v20  ;;  %943 = vmatprep.subr.bf16.mxu1 %v942_v30  ;;  %v334_v62 = vld [vmem:[#allocation2 + $0xa] sm:$0xff]  ;;  %v512_v0 = vld [vmem:[#allocation8 + $0x138] sm:$0xff]  ;;  %v1010_v4 = vpack.c.bf16 %v514_v3, %v513_v2  ;;  %v519_v11 = vld [vmem:[#allocation8 + $0x170] sm:$0xff] }
  0x92   : > { %979 = vmatprep.subr.bf16.mxu0 %v978_v27  ;;  %v1006_v1 = vpack.c.bf16 %v512_v0, %v511_v63  ;;  %v516_v6 = vld [vmem:[#allocation8 + $0x158] sm:$0xff]  ;;  %v517_v8 = vld [vmem:[#allocation8 + $0x160] sm:$0xff]  ;;  %v518_v9 = vld [vmem:[#allocation8 + $0x168] sm:$0xff] }
  0x93   : > { %v1014_v7 = vpack.c.bf16 %v516_v6, %v515_v5  ;;  %v1018_v10 = vpack.c.bf16 %v518_v9, %v517_v8  ;;  %v520_v12 = vld [vmem:[#allocation8 + $0x178] sm:$0xff]  ;;  %v503_v14 = vld [vmem:[#allocation2 + $0xc] sm:$0xff] }
  0x94   : > { %945 = vmatpush3.bf16.msra.mxu1 %v942_v30  ;;  %v1022_v13 = vpack.c.bf16 %v520_v12, %v519_v11  ;;  %v764_v18 = vld [vmem:[%s1603_s3] ss:$0 sm:$0xff] }
  0x95   : > { %981 = vmatpush3.bf16.msra.mxu0 %v978_v27  ;;  %947 = vmatprep.subr.bf16.mxu1 %v946_v38 }
  0x96   : > { %983 = vmatprep.subr.bf16.mxu0 %v982_v34 }
  0x98   : > { %949 = vmatpush3.bf16.msra.mxu1 %v946_v38 }
  0x99   : > { %985 = vmatpush3.bf16.msra.mxu0 %v982_v34  ;;  %951 = vmatprep.subr.bf16.mxu1 %v950_v44 }
  0x9a   : > { %987 = vmatprep.subr.bf16.mxu0 %v986_v41 }
  0x9c   : > { %953 = vmatpush3.bf16.msra.mxu1 %v950_v44 }
  0x9d   : > { %989 = vmatpush3.bf16.msra.mxu0 %v986_v41  ;;  %955 = vmatprep.subr.bf16.mxu1 %v954_v50 }
  0x9e   : > { %991 = vmatprep.subr.bf16.mxu0 %v990_v47 }
  0xa0   : > { %957 = vmatpush3.bf16.msra.mxu1 %v954_v50 }
  0xa1   : > { %993 = vmatpush3.bf16.msra.mxu0 %v990_v47  ;;  %959 = vmatprep.subr.bf16.mxu1 %v958_v56 }
  0xa2   : > { %995 = vmatprep.subr.bf16.mxu0 %v994_v53 }
  0xa4   : > { %893 = vmatmul.mubr.f32.vlgmr.msra.gmra.mrb[0].mxu0 %v1535_v15  ;;  %961 = vmatpush3.bf16.msra.mxu1 %v958_v56 }
  0xa5   : > { %997 = vmatpush3.bf16.msra.mxu0 %v994_v53  ;;  %927 = vmatprep.mubr.f32.mxu0 %v502_v58 }
  0xa6   : > { %999 = vmatprep.subr.bf16.mxu0 %v998_v57 }
  0xa7   : > { %858 = vmatmul.mubr.f32.vlgmr.msra.gmra.mrb[0].mxu1 %v334_v62 }
  0xa9   : > { %1001 = vmatpush3.bf16.msra.mxu0 %v998_v57 }
  0xaa   : > { %1003 = vmatprep.subr.bf16.mxu0 %v1002_v61 }
  0xad   : > { %1005 = vmatpush3.bf16.msra.mxu0 %v1002_v61 }
  0xae   : > { %1007 = vmatprep.subr.bf16.mxu0 %v1006_v1 }
  0xb1   : > { %1009 = vmatpush3.bf16.msra.mxu0 %v1006_v1 }
  0xb2   : > { %1011 = vmatprep.subr.bf16.mxu0 %v1010_v4 }
  0xb5   : > { %1013 = vmatpush3.bf16.msra.mxu0 %v1010_v4 }
  0xb6   : > { %1015 = vmatprep.subr.bf16.mxu0 %v1014_v7 }
  0xb9   : > { %1017 = vmatpush3.bf16.msra.mxu0 %v1014_v7 }
  0xba   : > { %1019 = vmatprep.subr.bf16.mxu0 %v1018_v10 }
  0xbd   : > { %1021 = vmatpush3.bf16.msra.mxu0 %v1018_v10 }
  0xbe   : > { %1023 = vmatprep.subr.bf16.mxu0 %v1022_v13 }
  0xc1   : > { %1025 = vmatpush3.bf16.msra.mxu0 %v1022_v13 }
  0xc4   : > { %928 = vmatmul.mubr.f32.vlgmr.msra.gmra.mrb[0].mxu0 %v503_v14 }
 0x17a   : > { %v859_v15 = vpop.f32.mrb[0].mxu1 }
 0x17b   : > { %v418_v16 = vpop.f32.mrb[1].mxu1 }
 0x197   : > { %v929_v17 = vpop.f32.mrb[0].mxu0 }
 0x198   : > { %v1026_v19 = vadd.f32 %v929_v17, %v859_v15  ;;  %v587_v20 = vpop.f32.mrb[1].mxu0 }
 0x199   : > { %v1027_v21 = vadd.f32 %v587_v20, %v418_v16 }
 0x19a   : > { %v606_v22 = vadd.f32 %v1026_v19, %v764_v18 }
 0x19b   : > { %v605_v23 = vadd.f32 %v1027_v21, %v764_v18 }
 0x19c   : > { %v608_v24 = vmax.f32 %v606_v22, 0.0 }
 0x19d   : > { %v607_v25 = vmax.f32 %v605_v23, 0.0 }
 0x19e   : > { %610 = vst [vmem:[%s300_s11 + $0x8] sm:$0xff] %v608_v24 }
 0x19f   : > { %609 = vst [vmem:[%s300_s11] sm:$0xff] %v607_v25 }
 0x1a0   : > { %1215 = shalt.err (!%p1212_p4)
}
 0x1a1   : > { %s1216_s27 = scalar_lea.hbm %s1551_s22, 256  ;;  %s1220_s8 = scalar_lea.hbm %s1604_s4, 512 }
 0x1a2   : > { %p1217_p8 = scmp.ne.s32.totalorder %s1551_s22, %s1216_s27  ;;  %p1221_p10 = scmp.lt.u32.totalorder %s1551_s22, %s1604_s4 }
 0x1a3   : > { %p1222_p11 = scmp.lt.u32.totalorder %s1220_s8, %s1216_s27  ;;  %p1224_p13 = scmp.lt.u32.totalorder %s1216_s27, %s1551_s22 }
 0x1a4   : > { %p1218_p12 = pnand %p1217_p8, %p1634_p0 }
 0x1a5   : > { %p1223_p3 = por %p1222_p11, %p1221_p10 }
 0x1a6   : > { %p1219_p6 = pneg %p1218_p12 }
 0x1a7   : > { %p1225_p5 = por %p1224_p13, %p1223_p3 }
 0x1a9   : > { %p1226_p9 = pnand %p1225_p5, %p1219_p6 }
 0x1ab   : > { %1229 = shalt.err (!%p1226_p9)
}
 0x1ac   : > { %s1300_s6 = smov 128   ;;  %s1301_s10 = smov 8  }
 0x1ad   : > { %1039 = dma.vmem_to_hbm [thread:$0]  (%p1634_p0), %s1546_s12, 256, %s1551_s22, %s612_s30, %s1300_s6, %s1300_s6, %s1301_s10  }
 0x1ae PF: > { %s642_s21 = sand.u32 1, %s1272_s15   ;;  %p1635_p1 = scmp.ne.s32.totalorder %s1617_s24, 0 }
 0x1af   : > { %p1636_p2 = scmp.ge.s32.totalorder %s1292_s20, 2  ;;  %s643_s23 = scalar_lea.sflag [#allocation5], %s642_s21 }
 0x1b1   : > { %p1053_p7 = pnand %p1636_p2, %p1635_p1 }
 0x1b3   : > { %1267 = dma.done.wait (!%p1053_p7), %s643_s23, 256  }
 0x1b4   : > { %1269 = vsyncadd (!%p1053_p7), %s643_s23, 4294967040  ;;  %s23_s20 = sadd.s32 1, %s1292_s20   ;;  %s1637_s11 = sld [smem:[#allocation14_spill]] }
 0x1b5   : > { %p20_p4 = scmp.ge.s32.totalorder %s23_s20, 4   ;;  %s1638_s17 = sld [smem:[#allocation16_spill]] }
 0x1b6   : > { %s1639_s28 = sld [smem:[#allocation15_spill]]  ;;  %s1640_s15 = smov %s1276_s16 }
 0x1b7   : > { %s1642_s18 = smov %s1288_s19  ;;  %22 = sbr.rel (!%p20_p4) target bundleno = 11 (0xb), region = 100 }
 0x1ba   : > { %s1641_s16 = smov %s1637_s11 }
 0x1bc   : > { %s1643_s19 = smov %s1639_s28 }
 0x1be   :  { %648 = vsyncpa [#allocation4], 1 }
 0x1bf   :  { %650 = vsyncpa [#allocation4 + $0x1], 1 }
 0x1c0   :  { %651 = vsyncpa [#allocation7], 1 }
 0x1c1   :  { %653 = vsyncpa [#allocation7 + $0x1], 1 }
 0x1c2   :  { %654 = vsyncpa [#allocation5], 1 }
 0x1c3   :  { %656 = vsyncpa [#allocation5 + $0x1], 1 }

</bundles_post_ra>
